<compile_context>
chip_gen: v7x
topology: tpu7x:2x2x1
jax: 0.10.0
libtpu: 0.0.40
codegen_flags: <defaults>
</compile_context>

<pallas_src>
import functools
import math

import jax
import jax.numpy as jnp
from jax import lax
from jax.experimental import pallas as pl
from jax.experimental.pallas import tpu as pltpu


def _inner_matrix_kernel(a_ref, b_ref, o_ref, *, scale, scale_operand, mxu_dtype):
    # a_ref: (G, TI, D), b_ref: (G, TJ, D), o_ref: (G, TI, TJ)
    a = a_ref[...]
    b = b_ref[...]
    if scale_operand:
        # Pre-scale the (smaller, full-precision) lhs tile before the MXU.
        a = a * scale
    if mxu_dtype is not None and a.dtype != mxu_dtype:
        a = a.astype(mxu_dtype)
        b = b.astype(mxu_dtype)
    # Batched NT contraction on the MXU: contract D directly (no explicit
    # transpose of b), accumulate in f32.
    s = lax.dot_general(
        a,
        b,
        dimension_numbers=(((2,), (2,)), ((0,), (0,))),
        preferred_element_type=jnp.float32,
    )
    if not scale_operand:
        # Scale the f32 accumulator (numerically safest; cheaper when TJ < D).
        s = s * scale
    o_ref[...] = s.astype(o_ref.dtype)


def _vmem_capacity_bytes():
    """Physical VMEM per TensorCore; conservative fallback if unknown."""
    try:
        info = pltpu.get_tpu_info()
        cap = int(getattr(info, "vmem_capacity_bytes", 0) or 0)
        if cap > 0:
            return cap
    except Exception:
        pass
    return 64 * 1024 * 1024  # v7x per-TC VMEM (smallest across generations)


def _per_step_bytes(g, ti, tj, d, in_itemsize, out_itemsize):
    """Per-grid-step VMEM footprint: double-buffered blocks + intermediates."""
    blocks = 2 * ((ti + tj) * d * in_itemsize + ti * tj * out_itemsize)
    interm = ti * tj * 4          # f32 accumulator before the output cast
    interm += ti * d * in_itemsize  # scaled copy of the a tile (worst case)
    return g * (blocks + interm)


def _pick_group_size(bh, g_cap, blocks_per_head, min_steps=8):
    """Largest divisor G of `bh` with G <= g_cap that still leaves the grid
    with >= min_steps steps (falling back to >= 2, then 1), so the pipeline
    stays double-buffered and work can be sharded across both TensorCores."""
    g_cap = max(1, min(bh, g_cap))
    total = bh * blocks_per_head
    for target in (min(min_steps, total), min(2, total), 1):
        for g in range(g_cap, 0, -1):
            if bh % g == 0 and (bh // g) * blocks_per_head >= target:
                return g
    return 1


def inner_matrix(a, b, *, tile_i=1024, tile_j=512, out_dtype=None,
                 use_bf16_matmul=False):
    """einsum('bhid,bhjd->bhij', a, b) / sqrt(D) via a Pallas TPU kernel."""
    B, H, I, D = a.shape
    Bb, Hb, J, Db = b.shape
    assert (B, H, D) == (Bb, Hb, Db), "a and b must share batch/head/feature dims"
    BH = B * H
    scale = 1.0 / math.sqrt(D)

    out_dtype = jnp.dtype(out_dtype if out_dtype is not None else a.dtype)
    in_itemsize = jnp.dtype(a.dtype).itemsize
    out_itemsize = out_dtype.itemsize

    a3 = a.reshape(BH, I, D)
    b3 = b.reshape(BH, J, D)

    # ---- Generation-aware VMEM budgets ------------------------------------
    vmem_cap = _vmem_capacity_bytes()
    vmem_limit = int(min(vmem_cap // 2, 64 * 1024 * 1024))  # ~32MiB v7x, 64MiB v5e/v6e
    block_budget = vmem_limit // 2                           # blocks + temps budget

    # ---- Tile selection ----------------------------------------------------
    # Lane-dense output tiles: TJ is a multiple of 128 or J itself; TI is a
    # multiple of 8 or I itself.  Full-extent blocks are always legal.
    TI = I if I <= tile_i else tile_i
    TJ = J if J <= tile_j else tile_j

    # Shrink tiles (keeping (8,128) legality) if a single step would blow the
    # VMEM budget (only triggers for unusually large D).
    while _per_step_bytes(1, TI, TJ, D, in_itemsize, out_itemsize) > block_budget:
        if TI > 256:
            TI = max(256, (TI // 2 // 8) * 8)
        elif TJ > 128:
            TJ = max(128, (TJ // 2 // 128) * 128)
        elif TI > 8:
            TI = max(8, (TI // 2 // 8) * 8)
        else:
            break  # TODO(synk): D itself is never tiled; extreme D may still spill.

    ni = pl.cdiv(I, TI)
    nj = pl.cdiv(J, TJ)

    # ---- Head batching (G heads per grid step) -----------------------------
    per_head = _per_step_bytes(1, TI, TJ, D, in_itemsize, out_itemsize)
    g_vmem_max = max(1, block_budget // max(per_head, 1))
    G = _pick_group_size(BH, g_vmem_max, ni * nj)

    grid = (BH // G, ni, nj)

    # Scale placement: pre-scale the f32 lhs when it is the smaller tensor;
    # otherwise scale the f32 accumulator (also whenever inputs are low-prec).
    scale_operand = (jnp.dtype(a.dtype) == jnp.float32
                     and not use_bf16_matmul
                     and D <= TJ)
    mxu_dtype = jnp.bfloat16 if use_bf16_matmul else None

    flops = 2 * BH * I * J * D
    bytes_accessed = (a3.size + b3.size) * in_itemsize + BH * I * J * out_itemsize
    cost = pl.CostEstimate(
        flops=flops, transcendentals=0, bytes_accessed=bytes_accessed
    )

    kernel = functools.partial(
        _inner_matrix_kernel,
        scale=scale,
        scale_operand=scale_operand,
        mxu_dtype=mxu_dtype,
    )

    out3 = pl.pallas_call(
        kernel,
        out_shape=jax.ShapeDtypeStruct((BH, I, J), out_dtype),
        grid_spec=pltpu.PrefetchScalarGridSpec(
            num_scalar_prefetch=0,
            grid=grid,
            in_specs=[
                # a block stays resident across the innermost jj sweep.
                pl.BlockSpec((G, TI, D), lambda g, ii, jj: (g, ii, 0)),
                pl.BlockSpec((G, TJ, D), lambda g, ii, jj: (g, jj, 0)),
            ],
            out_specs=pl.BlockSpec((G, TI, TJ), lambda g, ii, jj: (g, ii, jj)),
        ),
        compiler_params=pltpu.CompilerParams(
            # No reduction axis (D is kept whole), so every grid axis is
            # parallel -> shards across v7x's 2 TensorCores.
            dimension_semantics=("parallel", "parallel", "parallel"),
            vmem_limit_bytes=vmem_limit,
        ),
        cost_estimate=cost,
    )(a3, b3)

    return out3.reshape(B, H, I, J)


if __name__ == "__main__":
    key = jax.random.PRNGKey(0)
    ka, kb, kc, kd = jax.random.split(key, 4)

    # Small canonical shape (matches the module's attention-score use).
    B, H, I, J, D = 2, 4, 8, 8, 32
    a = jax.random.normal(ka, (B, H, I, D), dtype=jnp.float32)
    b = jax.random.normal(kb, (B, H, J, D), dtype=jnp.float32)
    out = jax.block_until_ready(inner_matrix(a, b))
    ref = jnp.einsum("bhid,bhjd->bhij", a, b) / math.sqrt(D)
    assert out.shape == (B, H, I, J)
    assert jnp.allclose(out, ref, atol=1e-5, rtol=1e-5)

    # Tiled path with non-divisible I / J (exercises remainder-tile masking
    # and the pre-scaled-operand branch).
    B2, H2, I2, J2, D2 = 1, 2, 24, 200, 64
    a2 = jax.random.normal(kc, (B2, H2, I2, D2), dtype=jnp.float32)
    b2 = jax.random.normal(kd, (B2, H2, J2, D2), dtype=jnp.float32)
    out2 = jax.block_until_ready(inner_matrix(a2, b2, tile_i=16, tile_j=128))
    ref2 = jnp.einsum("bhid,bhjd->bhij", a2, b2) / math.sqrt(D2)
    assert out2.shape == (B2, H2, I2, J2)
    assert jnp.allclose(out2, ref2, atol=1e-4, rtol=1e-4)

    print("KERNEL_OK")
</pallas_src>

<mosaic_0001>
module attributes {stable_mosaic.version = 11 : i64} {
  func.func @_inner_matrix_kernel(%arg0: i32, %arg1: i32, %arg2: i32, %arg3: memref<1x8x32xf32, #tpu.memory_space<vmem>>, %arg4: memref<1x8x32xf32, #tpu.memory_space<vmem>>, %arg5: memref<1x8x8xf32, #tpu.memory_space<vmem>>) attributes {dimension_semantics = [#tpu.dimension_semantics<parallel>, #tpu.dimension_semantics<parallel>, #tpu.dimension_semantics<parallel>], iteration_bounds = array<i64: 8, 1, 1>, scalar_prefetch = 0 : i64, scratch_operands = 0 : i64, tpu.core_type = #tpu.core_type<tc>, window_params = [{transform_indices = @transform_0, window_bounds = array<i64: 1, 8, 32>}, {transform_indices = @transform_1, window_bounds = array<i64: 1, 8, 32>}, {transform_indices = @transform_2, window_bounds = array<i64: 1, 8, 8>}]} {
    %c0 = arith.constant 0 : index
    %c0_0 = arith.constant 0 : index
    %c0_1 = arith.constant 0 : index
    %0 = vector.load %arg3[%c0, %c0_0, %c0_1] : memref<1x8x32xf32, #tpu.memory_space<vmem>>, vector<1x8x32xf32>
    %c0_2 = arith.constant 0 : index
    %c0_3 = arith.constant 0 : index
    %c0_4 = arith.constant 0 : index
    %1 = vector.load %arg4[%c0_2, %c0_3, %c0_4] : memref<1x8x32xf32, #tpu.memory_space<vmem>>, vector<1x8x32xf32>
    %cst = arith.constant dense<0.000000e+00> : vector<1x8x8xf32>
    %2 = tpu.matmul %0, %1, %cst {dimension_numbers = #tpu.dot_dimension_numbers<[2], [2], [1], [1], [0, 0, 0, 1, 1, 1], [0], [0]>} : vector<1x8x32xf32>, vector<1x8x32xf32>, vector<1x8x8xf32> -> vector<1x8x8xf32>
    %cst_5 = arith.constant 0.176776692 : f32
    %3 = vector.broadcast %cst_5 : f32 to vector<1x8x8xf32>
    %4 = arith.mulf %2, %3 : vector<1x8x8xf32>
    %c0_6 = arith.constant 0 : index
    %c0_7 = arith.constant 0 : index
    %c0_8 = arith.constant 0 : index
    %5 = vector.load %arg5[%c0_6, %c0_7, %c0_8] : memref<1x8x8xf32, #tpu.memory_space<vmem>>, vector<1x8x8xf32>
    tpu.vector_store %arg5[%c0_6, %c0_7, %c0_8], %4 {strides = array<i32>} : memref<1x8x8xf32, #tpu.memory_space<vmem>>, vector<1x8x8xf32>,
    return
  }
  func.func @transform_0(%arg0: i32, %arg1: i32, %arg2: i32) -> (i32, i32, i32) {
    %c0_i32 = arith.constant 0 : i32
    %c0_i32_0 = arith.constant 0 : i32
    return %arg0, %arg1, %c0_i32 : i32, i32, i32
  }
  func.func @transform_1(%arg0: i32, %arg1: i32, %arg2: i32) -> (i32, i32, i32) {
    %c0_i32 = arith.constant 0 : i32
    %c0_i32_0 = arith.constant 0 : i32
    return %arg0, %arg2, %c0_i32 : i32, i32, i32
  }
  func.func @transform_2(%arg0: i32, %arg1: i32, %arg2: i32) -> (i32, i32, i32) {
    %c0_i32 = arith.constant 0 : i32
    return %arg0, %arg1, %arg2 : i32, i32, i32
  }
}

</mosaic_0001>

<bundles_post_ra>
// kernel: tpu_custom_call.1
= control target key start
LH: loop header
LB: loop body
LE: loop exit
PB: predicated region body
PF: predicated region fallthrough
CT: control target
= control target key end

     0   :  { %7 = vsyncpa [#allocation3], 0  ;;  %s911_s0 = inlined_call_operand.hbm [shape: f32[8,8,32], index: 0, kind: input, shape index: {}]   ;;  %s912_s1 = inlined_call_operand.hbm [shape: f32[8,8,32], index: 1, kind: input, shape index: {}]   ;;  %s913_s2 = inlined_call_operand.hbm [shape: f32[8,8,8], index: 2, kind: output, shape index: {}]  }
   0x1   :  { %9 = vsyncpa [#allocation3 + $0x1], 0 }
   0x2   :  { %10 = vsyncpa [#allocation6], 0 }
   0x3   :  { %12 = vsyncpa [#allocation6 + $0x1], 0 }
   0x4   :  { %13 = vsyncpa [#allocation4], 0 }
   0x5   :  { %15 = vsyncpa [#allocation4 + $0x1], 0  ;;  %s693_s9 = smov 0   ;;  %s695_s10 = smov 0  }
   0x6   :  { %s697_s11 = smov 0   ;;  %s699_s12 = smov 0  }
   0x7   :  { %s701_s13 = smov 0   ;;  %s703_s14 = smov 0  }
   0x8 LB: > { %s431_s15 = sadd.s32 4294967295, %s671_s14   ;;  %s432_s16 = sadd.s32 4294967294, %s671_s14   ;;  %s671_s14 = sphi %s703_s14, %s21_s14   ;;  %s667_s13 = sphi %s701_s13, %s932_s13   ;;  %s663_s12 = sphi %s699_s12, %s931_s12   ;;  %s659_s11 = sphi %s697_s11, %s930_s11   ;;  %s655_s10 = sphi %s695_s10, %s929_s10   ;;  %s651_s9 = sphi %s693_s9, %s928_s9  }
   0x9   : > { %s40_s17 = sadd.s32 1, %s667_s13  ;;  %s49_s18 = sadd.s32 1, %s659_s11 }
   0xa   : > { %p42_p0 = scmp.ge.s32.totalorder %s40_s17, 8  ;;  %p56_p1 = scmp.ne.s32.totalorder %s659_s11, %s655_s10 }
   0xb   : > { %p57_p2 = scmp.eq.s32.totalorder %s671_s14, 0  ;;  %p62_p3 = scmp.ne.s32.totalorder %s655_s10, %s651_s9 }
   0xc   : > { %s934_s17 = smov (%p42_p0, %s40_s17), 0  ;;  %p63_p5 = scmp.eq.s32.totalorder %s431_s15, 0 }
   0xd   : > { %p734_p4 = por %p57_p2, %p56_p1  ;;  %s44_s20 = ssub.s32 %s667_s13, %s934_s17 }
   0xe   : > { %p118_p6 = scmp.eq.s32.totalorder %s431_s15, 7  ;;  %p47_p7 = scmp.eq.s32.totalorder %s44_s20, 0 }
   0xf   : > { %p740_p8 = por %p63_p5, %p62_p3  ;;  %p124_p10 = scmp.eq.s32.totalorder %s432_s16, 7 }
  0x10   : > { %p744_p9 = por %p118_p6, %p56_p1  ;;  %p473_p12 = scmp.lt.s32.totalorder %s671_s14, 8 }
  0x11   : > { %s917_s21 = scalar_select %p740_p8, 1, 0 }
  0x12   : > { %s918_s22 = scalar_select %p744_p9, 1, 0 }
  0x13   : > { %s749_s23 = scalar_select %p47_p7, %s659_s11, %s49_s18  }
  0x14   : > { %p751_p11 = por %p124_p10, %p62_p3  ;;  %s757_s25 = sand.u32 1, %s659_s11  }
  0x15   : > { %s435_s26 = sshll.u32 %s757_s25, 3  ;;  %s436_s27 = sshll.u32 %s667_s13, 7 }
  0x16   : > { %s919_s24 = scalar_select %p751_p11, 1, 0 }
  0x17   : > { %s766_s30 = scalar_lea.hbm %s911_s0, %s436_s27  ;;  %s148_s3 = scalar_lea.vmem [#allocation2], %s435_s26 }
  0x18   : > { %s156_s4 = sshll.u32 %s148_s3, 4  ;;  %p774_p13 = pnand %p473_p12, %p734_p4  ;;  %s770_s4 = int_to_ptr.vmem [resolvable:$true] %s156_s4 }
  0x19   : > { %s145_s6 = scalar_lea.sflag [#allocation3], %s757_s25  ;;  %s525_s7 = scalar_lea.hbm %s766_s30, 128 }
  0x1a   : > { %p526_p2 = scmp.ne.s32.totalorder %s766_s30, %s525_s7  ;;  %p527_p3 = pneg %p774_p13 }
  0x1b   : > { %s530_s16 = scalar_lea.hbm %s911_s0, 1024  ;;  %p531_p4 = scmp.lt.u32.totalorder %s766_s30, %s911_s0 }
  0x1c   : > { %p528_p5 = pnand %p527_p3, %p526_p2  ;;  %p532_p7 = scmp.lt.u32.totalorder %s530_s16, %s525_s7 }
  0x1d   : > { %p534_p12 = scmp.lt.u32.totalorder %s525_s7, %s766_s30 }
  0x1e   : > { %p529_p6 = pneg %p528_p5  ;;  %p533_p10 = por %p532_p7, %p531_p4 }
  0x20   : > { %p535_p0 = por %p534_p12, %p533_p10 }
  0x22   : > { %p536_p1 = pnand %p535_p0, %p529_p6 }
  0x24   : > { %539 = shalt.err (!%p536_p1)
}
  0x25   : > { %s540_s20 = scalar_lea.vmem %s770_s4, 128  ;;  %s673_s28 = smov [#allocation2]  }
  0x26   : > { %p541_p2 = scmp.ne.s32.totalorder %s770_s4, %s540_s20  ;;  %s545_s29 = sshll.u32 %s673_s28, 4  ;;  %s546_s29 = int_to_ptr.vmem [resolvable:$false] %s545_s29 }
  0x27   : > { %s547_s3 = scalar_lea.vmem %s546_s29, 256  ;;  %p548_p9 = scmp.lt.s32.totalorder %s770_s4, %s546_s29 }
  0x28   : > { %p543_p5 = pnand %p541_p2, %p527_p3  ;;  %p549_p4 = scmp.lt.s32.totalorder %s547_s3, %s540_s20 }
  0x2a   : > { %p544_p11 = pneg %p543_p5  ;;  %p550_p7 = por %p549_p4, %p548_p9 }
  0x2c   : > { %p551_p10 = pnand %p550_p7, %p544_p11 }
  0x2e   : > { %554 = shalt.err (!%p551_p10)
}
  0x2f   : > { %465 = dma.hbm_to_vmem [thread:$0]  (!%p774_p13), %s766_s30, 128, %s770_s4, %s145_s6  }
  0x30   : > { %p921_p0 = scmp.lt.s32.totalorder %s671_s14, 9  ;;  %p922_p1 = scmp.ge.s32.totalorder %s671_s14, 1 }
  0x31   : > { %s819_s16 = scalar_lea.hbm %s912_s1, %s436_s27  ;;  %s167_s18 = scalar_lea.vmem [#allocation5], %s435_s26 }
  0x32   : > { %p810_p6 = pnand %p922_p1, %p921_p0  ;;  %s175_s19 = sshll.u32 %s167_s18, 4  ;;  %s176_s19 = int_to_ptr.vmem [resolvable:$true] %s175_s19 }
  0x33   : > { %s164_s30 = scalar_lea.sflag [#allocation6], %s757_s25  ;;  %s555_s4 = scalar_lea.hbm %s819_s16, 128 }
  0x34   : > { %s923_s7 = scalar_select %p810_p6, 1, 0 }
  0x35   : > { %p556_p9 = scmp.ne.s32.totalorder %s819_s16, %s555_s4  ;;  %s560_s27 = scalar_lea.hbm %s912_s1, 1024 }
  0x36   : > { %p561_p2 = scmp.lt.u32.totalorder %s819_s16, %s912_s1  ;;  %p562_p5 = scmp.lt.u32.totalorder %s560_s27, %s555_s4 }
  0x37   : > { %p558_p11 = pnand %p556_p9, %p527_p3  ;;  %p564_p7 = scmp.lt.u32.totalorder %s555_s4, %s819_s16 }
  0x38   : > { %p563_p4 = por %p562_p5, %p561_p2 }
  0x39   : > { %p559_p12 = pneg %p558_p11 }
  0x3a   : > { %p565_p10 = por %p564_p7, %p563_p4 }
  0x3c   : > { %p566_p0 = pnand %p565_p10, %p559_p12 }
  0x3e   : > { %569 = shalt.err (!%p566_p0)
}
  0x3f   : > { %s570_s25 = scalar_lea.vmem %s176_s19, 128  ;;  %s674_s26 = smov [#allocation5]  }
  0x40   : > { %p571_p1 = scmp.ne.s32.totalorder %s176_s19, %s570_s25  ;;  %s575_s3 = sshll.u32 %s674_s26, 4  ;;  %s576_s3 = int_to_ptr.vmem [resolvable:$false] %s575_s3 }
  0x41   : > { %s577_s8 = scalar_lea.vmem %s576_s3, 256  ;;  %p578_p8 = scmp.lt.s32.totalorder %s176_s19, %s576_s3 }
  0x42   : > { %p573_p9 = pnand %p571_p1, %p527_p3  ;;  %p579_p6 = scmp.lt.s32.totalorder %s577_s8, %s570_s25 }
  0x44   : > { %p574_p11 = pneg %p573_p9  ;;  %p580_p2 = por %p579_p6, %p578_p8 }
  0x46   : > { %p581_p5 = pnand %p580_p2, %p574_p11 }
  0x48   : > { %584 = shalt.err (!%p581_p5)
}
  0x49   : > { %468 = dma.hbm_to_vmem [thread:$0]  (!%p774_p13), %s819_s16, 128, %s176_s19, %s164_s30  }
  0x4a   : > { %p924_p12 = scmp.ne.s32.totalorder %s923_s7, 0 }
  0x4b   : > { %s846_s15 = sand.u32 (!%p924_p12), 1, %s655_s10   ;;  %p925_p3 = scmp.ne.s32.totalorder (!%p924_p12), %s917_s21, 0 }
  0x4c   : > { %184 = sbr.rel (%p924_p12) target bundleno = 319 (0x13f), region = 28  ;;  %s440_s18 = sshll.u32 (!%p924_p12), %s846_s15, 3 }
  0x4d   : > { %s187_s4 = scalar_lea.sflag (!%p924_p12), [#allocation3], %s846_s15  ;;  %s190_s6 = scalar_lea.vmem (!%p924_p12), [#allocation2], %s440_s18 }
  0x53   : > { %638 = dma.done.wait (%p925_p3), %s187_s4, 128  }
  0x54   : > { %640 = vsyncadd (%p925_p3), %s187_s4, 4294967168  ;;  %s196_s5 = scalar_lea.sflag [#allocation6], %s846_s15  ;;  %s199_s16 = scalar_lea.vmem [#allocation5], %s440_s18 }
  0x55   : > { %642 = dma.done.wait (%p925_p3), %s196_s5, 128  }
  0x56   : > { %644 = vsyncadd (%p925_p3), %s196_s5, 4294967168  ;;  %v675_v0 = vmov 0.0   ;;  %vm676_vm0 = vmmov 0   ;;  %vm227_vm1 = vcmask 261120   ;;  %v226_v1 = vld [vmem:[%s199_s16] sm:$0xff]  ;;  %v225_v2 = vld [vmem:[%s190_s6] sm:$0xff] }
  0x57   : > { %451 = vmatprep.subr.mxu0 %v675_v0  ;;  %453 = vmatprep.mubr.msk.f32.mxu0 %vm676_vm0, %v675_v0  ;;  %s446_s7 = sshll.u32 %s663_s12, 7  ;;  %s224_s19 = scalar_lea.vmem [#allocation7], %s440_s18  ;;  %vm305_vm2 = vcmask 64512  }
  0x58   : > { %452 = vmatpush3.xpose.msk.msra.mxu0 %vm227_vm1, %v226_v1  ;;  %s323_s30 = sshll.u32 %s224_s19, 4  ;;  %s863_s27 = scalar_lea.hbm %s913_s2, %s446_s7  ;;  %s865_s30 = int_to_ptr.vmem [resolvable:$true] %s323_s30 }
  0x59   : > { %s308_s28 = scalar_lea.sflag [#allocation4], %s846_s15  ;;  %s585_s29 = scalar_lea.vmem %s865_s30, 128 }
  0x5a   : > { %p586_p8 = scmp.ne.s32.totalorder %s865_s30, %s585_s29  ;;  %p926_p13 = scmp.ne.s32.totalorder %s918_s22, 0 }
  0x5b   : > { %454 = vmatmul.mubr.msk.f32.vlgmr.msra.gmra.mrb[0].mxu0 %vm227_vm1, %v225_v2  ;;  %s677_s12 = smov [#allocation7]  }
  0x5c   : > { %p587_p6 = pnand %p586_p8, %p926_p13  ;;  %s589_s25 = sshll.u32 %s677_s12, 4  ;;  %s590_s25 = int_to_ptr.vmem [resolvable:$false] %s589_s25 }
  0x5d   : > { %s591_s26 = scalar_lea.vmem %s590_s25, 256  ;;  %p592_p7 = scmp.lt.s32.totalorder %s865_s30, %s590_s25 }
  0x5e   : > { %p588_p4 = pneg %p587_p6  ;;  %p593_p10 = scmp.lt.s32.totalorder %s591_s26, %s585_s29 }
  0x60   : > { %p594_p0 = por %p593_p10, %p592_p7 }
  0x62   : > { %p595_p1 = pnand %p594_p0, %p588_p4 }
 0x12e   : > { %v300_v3 = vpop.f32.mrb[0].mxu0 }
 0x12f   : > { %v304_v4 = vmul.f32 0.17677669, %v300_v3  ;;  %v455_v5 = vpop.f32.mrb[1].mxu0 }
 0x131   : > { %306 = vst.msk [vmem:[%s224_s19] sm:$0xff] %vm305_vm2, %v304_v4 }
 0x132   : > { %598 = shalt.err (!%p595_p1)
}
 0x133   : > { %s599_s3 = scalar_lea.hbm %s863_s27, 128  ;;  %s603_s18 = scalar_lea.hbm %s913_s2, 1024 }
 0x134   : > { %p600_p9 = scmp.ne.s32.totalorder %s863_s27, %s599_s3  ;;  %p604_p5 = scmp.lt.u32.totalorder %s863_s27, %s913_s2 }
 0x135   : > { %p605_p12 = scmp.lt.u32.totalorder %s603_s18, %s599_s3  ;;  %p607_p8 = scmp.lt.u32.totalorder %s599_s3, %s863_s27 }
 0x136   : > { %p601_p11 = pnand %p600_p9, %p926_p13 }
 0x137   : > { %p606_p3 = por %p605_p12, %p604_p5 }
 0x138   : > { %p602_p2 = pneg %p601_p11 }
 0x139   : > { %p608_p6 = por %p607_p8, %p606_p3 }
 0x13b   : > { %p609_p4 = pnand %p608_p6, %p602_p2 }
 0x13d   : > { %612 = shalt.err (!%p609_p4)
}
 0x13e   : > { %460 = dma.vmem_to_hbm [thread:$0]  (%p926_p13), %s865_s30, 128, %s863_s27, %s308_s28  }
 0x13f PF: > { %p474_p7 = scmp.ge.s32.totalorder %s671_s14, 2  ;;  %s335_s5 = sand.u32 1, %s651_s9  }
 0x140   : > { %p927_p10 = scmp.ne.s32.totalorder %s919_s24, 0  ;;  %s336_s16 = scalar_lea.sflag [#allocation4], %s335_s5 }
 0x142   : > { %p470_p0 = pnand %p474_p7, %p927_p10 }
 0x144   : > { %646 = dma.done.wait (!%p470_p0), %s336_s16, 128  }
 0x145   : > { %648 = vsyncadd (!%p470_p0), %s336_s16, 4294967168  ;;  %s21_s14 = sadd.s32 1, %s671_s14   ;;  %s928_s9 = smov %s655_s10 }
 0x146   : > { %p18_p1 = scmp.ge.s32.totalorder %s21_s14, 10   ;;  %s929_s10 = smov %s659_s11 }
 0x147   : > { %s930_s11 = smov %s749_s23  ;;  %s931_s12 = smov %s667_s13 }
 0x148   : > { %s932_s13 = smov %s934_s17  ;;  %20 = sbr.rel (!%p18_p1) target bundleno = 8 (0x8), region = 86 }
 0x14f   :  { %341 = vsyncpa [#allocation3], 1 }
 0x150   :  { %343 = vsyncpa [#allocation3 + $0x1], 1 }
 0x151   :  { %344 = vsyncpa [#allocation6], 1 }
 0x152   :  { %346 = vsyncpa [#allocation6 + $0x1], 1 }
 0x153   :  { %347 = vsyncpa [#allocation4], 1 }
 0x154   :  { %349 = vsyncpa [#allocation4 + $0x1], 1 }

</bundles_post_ra>
